<compile_context>
chip_gen: v5e
topology: v5e:2x2
jax: 0.10.0
libtpu: 0.0.40
codegen_flags: <defaults>
</compile_context>

<pallas_src>
import jax
import jax.numpy as jnp
from jax.experimental import pallas as pl
from jax.experimental.pallas import tpu as pltpu

BN_EPS = 1e-5
LN_EPS = 1e-5

ATOM_VOCABS = [119, 5, 12, 12, 10, 6, 6, 2, 2]   # OGB atom feature dims
BOND_VOCABS = [5, 6, 2]                           # OGB bond feature dims

LANE = 128
SUBLANE = 8


def _round_up(v, m):
    return ((v + m - 1) // m) * m


# ----------------------------- fused Pallas kernel ----------------------------

def _make_fused_kernel(d_real: int, dp: int):
    """Kernel factory closing over the real (unpadded) feature width."""
    inv_d = 1.0 / float(d_real)

    def kernel(x0_ref, ea_ref, g_ref, gd_ref, p_ref, lw_ref, lb_ref,   # resident inputs
               eps_ref,                                                # SMEM per-block eps
               w1_ref, b1_ref, w2_ref, b2_ref, lng_ref, lnb_ref,       # per-block weights
               out_ref,                                                # [Bp, Cp] (resident)
               x_vmem):                                                # node state scratch
        l = pl.program_id(0)
        nb = pl.num_programs(0)

        @pl.when(l == 0)
        def _():
            x_vmem[...] = x0_ref[...]

        x = x_vmem[...]                                   # [Np, Dp]
        g = g_ref[...].astype(jnp.float32)                # [Ep, Np] one-hot src (bf16 exact)
        gd = gd_ref[...].astype(jnp.float32)              # [Ep, Np] one-hot dst (bf16 exact)

        # message passing: gather src rows, relu(x_j + e), scatter-add to dst.
        x_src = jnp.dot(g, x, preferred_element_type=jnp.float32)            # [Ep, Dp]
        msg = jnp.maximum(x_src + ea_ref[...], 0.0)                           # [Ep, Dp]
        # contract the leading (edge) axis of the dst one-hot: no HBM transpose needed.
        agg = jax.lax.dot_general(gd, msg, (((0,), (0,)), ((), ())),
                                  preferred_element_type=jnp.float32)         # [Np, Dp]
        h = (1.0 + eps_ref[l]) * x + agg

        # MLP with eval-BatchNorm pre-folded into (w1, b1): Linear -> ReLU -> Linear.
        z = jnp.maximum(
            jnp.dot(h, w1_ref[...], preferred_element_type=jnp.float32) + b1_ref[...], 0.0)
        h2 = jnp.dot(z, w2_ref[...], preferred_element_type=jnp.float32) + b2_ref[...]

        # LayerNorm over the REAL feature width (padded lanes of h2 are exactly 0), + ReLU.
        lane = jax.lax.broadcasted_iota(jnp.int32, (1, dp), 1)
        mask = (lane < d_real).astype(jnp.float32)
        mu = jnp.sum(h2, axis=-1, keepdims=True) * inv_d
        diff = h2 - mu
        var = jnp.sum(diff * diff * mask, axis=-1, keepdims=True) * inv_d
        y = diff * jax.lax.rsqrt(var + LN_EPS) * lng_ref[...] + lnb_ref[...]
        x_new = jnp.maximum(y, 0.0)
        x_vmem[...] = x_new

        # fused readout on the final block: mean-pool matmul + lin2.
        @pl.when(l == nb - 1)
        def _():
            pooled = jnp.dot(p_ref[...], x_new, preferred_element_type=jnp.float32)
            out_ref[...] = (jnp.dot(pooled, lw_ref[...], preferred_element_type=jnp.float32)
                            + lb_ref[...])

    return kernel


# ----------------------------- parameter setup (glue) --------------------------

def init_params(key, d, out_channels, num_layers):
    ks = iter(jax.random.split(key, 256))

    def nrm(shape, scale=0.1):
        return scale * jax.random.normal(next(ks), shape, dtype=jnp.float32)

    atom_tables = [nrm((v, d)) for v in ATOM_VOCABS]
    bond_tables = [nrm((v, d)) for v in BOND_VOCABS]

    def gin_params():
        return dict(
            eps=jnp.zeros((), jnp.float32),
            w1=nrm((d, 2 * d)), b1=nrm((1, 2 * d)),
            bn_gamma=1.0 + nrm((1, 2 * d), 0.05),
            bn_beta=nrm((1, 2 * d), 0.05),
            bn_mean=nrm((1, 2 * d), 0.05),
            bn_var=1.0 + jnp.abs(nrm((1, 2 * d), 0.05)),
            w2=nrm((2 * d, d)), b2=nrm((1, d)),
            ln_gamma=jnp.ones((1, d), jnp.float32),
            ln_beta=jnp.zeros((1, d), jnp.float32),
        )

    blocks = [gin_params() for _ in range(2 * num_layers)]  # [gconvs1[i], gconvs2[i]] x L
    lin2_w = nrm((d, out_channels))
    lin2_b = nrm((1, out_channels))
    return atom_tables, bond_tables, blocks, lin2_w, lin2_b


def embed(tables, feats):
    # sum of per-feature embedding lookups (AtomEncoder / BondEncoder semantics)
    out = jnp.zeros((feats.shape[0], tables[0].shape[1]), jnp.float32)
    for k, tbl in enumerate(tables):
        out = out + jnp.take(tbl, feats[:, k], axis=0)
    return out


# ----------------------------- forward (Pallas) --------------------------------

def graph_transformer_forward(node_feats, edge_index, edge_feats, batch,
                              num_graphs, params):
    atom_tables, bond_tables, blocks, lin2_w, lin2_b = params
    n = node_feats.shape[0]
    e = edge_feats.shape[0]
    d = atom_tables[0].shape[1]
    c = lin2_w.shape[1]
    nb = len(blocks)

    # padded shapes: feature dims -> 128 lanes, row dims -> 8 sublanes.
    dp = _round_up(d, LANE)
    hp = _round_up(2 * d, LANE)
    cp = _round_up(c, LANE)
    np_ = _round_up(n, SUBLANE)
    ep = _round_up(e, SUBLANE)
    bp = _round_up(num_graphs, SUBLANE)

    # ---- encoders (tiny integer-index gathers; plain JAX) ----
    x = embed(atom_tables, node_feats)      # [N, D]
    ea = embed(bond_tables, edge_feats)     # [E, D]

    x0 = jnp.zeros((np_, dp), jnp.float32).at[:n, :d].set(x)
    eap = jnp.zeros((ep, dp), jnp.float32).at[:e, :d].set(ea)

    src, dst = edge_index[0], edge_index[1]
    # one-hot gather (src) / scatter (dst) matrices: 0/1 exact in bf16, padded edge rows
    # are all-zero so they contribute nothing.
    g = jnp.zeros((ep, np_), jnp.bfloat16).at[:e].set(
        jax.nn.one_hot(src, np_, dtype=jnp.bfloat16))
    gd = jnp.zeros((ep, np_), jnp.bfloat16).at[:e].set(
        jax.nn.one_hot(dst, np_, dtype=jnp.bfloat16))

    onehot_b = jax.nn.one_hot(batch, num_graphs, dtype=jnp.float32).T        # [B, N]
    counts = jnp.maximum(onehot_b.sum(axis=1, keepdims=True), 1.0)
    pmat = jnp.zeros((bp, np_), jnp.float32).at[:num_graphs, :n].set(onehot_b / counts)

    # ---- stack per-block weights; fold eval-BatchNorm into (w1, b1); pad lanes ----
    def prep(p):
        scale = p["bn_gamma"] * jax.lax.rsqrt(p["bn_var"] + BN_EPS)          # [1, 2D]
        w1f = p["w1"] * scale
        b1f = (p["b1"] - p["bn_mean"]) * scale + p["bn_beta"]
        w1p = jnp.zeros((dp, hp), jnp.float32).at[:d, :2 * d].set(w1f)
        b1p = jnp.zeros((1, hp), jnp.float32).at[:, :2 * d].set(b1f)
        w2p = jnp.zeros((hp, dp), jnp.float32).at[:2 * d, :d].set(p["w2"])
        b2p = jnp.zeros((1, dp), jnp.float32).at[:, :d].set(p["b2"])
        lngp = jnp.zeros((1, dp), jnp.float32).at[:, :d].set(p["ln_gamma"])
        lnbp = jnp.zeros((1, dp), jnp.float32).at[:, :d].set(p["ln_beta"])
        return w1p, b1p, w2p, b2p, lngp, lnbp

    stacked = [prep(p) for p in blocks]
    W1, B1, W2, B2, LNG, LNB = (jnp.stack(t) for t in zip(*stacked))
    EPS = jnp.stack([p["eps"] for p in blocks])                               # [NB] f32 (SMEM)

    LW = jnp.zeros((dp, cp), jnp.float32).at[:d, :c].set(lin2_w)
    LB = jnp.zeros((1, cp), jnp.float32).at[:, :c].set(lin2_b)

    const2 = lambda l: (0, 0)        # resident across all blocks (DMA'd once)
    perblk3 = lambda l: (l, 0, 0)    # select per-block stacked weights

    flops = nb * (4 * ep * np_ * dp + 4 * np_ * dp * hp) \
        + 2 * bp * np_ * dp + 2 * bp * dp * cp
    bytes_accessed = 4 * (np_ * dp + ep * dp + bp * np_ + dp * cp + cp + bp * cp
                          + nb * (dp * hp + hp + hp * dp + 3 * dp + 1)) \
        + 2 * (2 * ep * np_)

    out = pl.pallas_call(
        _make_fused_kernel(d, dp),
        out_shape=jax.ShapeDtypeStruct((bp, cp), jnp.float32),
        grid=(nb,),
        in_specs=[
            pl.BlockSpec((np_, dp), const2),                     # x0 (initial node feats)
            pl.BlockSpec((ep, dp), const2),                      # edge features
            pl.BlockSpec((ep, np_), const2),                     # one-hot src (bf16)
            pl.BlockSpec((ep, np_), const2),                     # one-hot dst (bf16)
            pl.BlockSpec((bp, np_), const2),                     # mean-pool matrix
            pl.BlockSpec((dp, cp), const2),                      # lin2 weight
            pl.BlockSpec((1, cp), const2),                       # lin2 bias
            pl.BlockSpec(memory_space=pltpu.MemorySpace.SMEM),   # eps per block (scalars)
            pl.BlockSpec((None, dp, hp), perblk3),               # W1 (BN folded)
            pl.BlockSpec((None, 1, hp), perblk3),                # B1 (BN folded)
            pl.BlockSpec((None, hp, dp), perblk3),               # W2
            pl.BlockSpec((None, 1, dp), perblk3),                # B2
            pl.BlockSpec((None, 1, dp), perblk3),                # LN gamma
            pl.BlockSpec((None, 1, dp), perblk3),                # LN beta
        ],
        out_specs=pl.BlockSpec((bp, cp), const2),                # resident; stored last step
        scratch_shapes=[pltpu.VMEM((np_, dp), jnp.float32)],     # node state x across blocks
        compiler_params=pltpu.CompilerParams(
            dimension_semantics=("arbitrary",),                  # sequential carry through x
            vmem_limit_bytes=48 * 1024 * 1024,                   # headroom vs v7x 64 MiB VMEM
        ),
        cost_estimate=pl.CostEstimate(
            flops=int(flops),
            transcendentals=int(nb * np_),
            bytes_accessed=int(bytes_accessed)),
    )(x0, eap, g, gd, pmat, LW, LB, EPS, W1, B1, W2, B2, LNG, LNB)

    return out[:num_graphs, :c]


# ----------------------------- pure-JAX reference ------------------------------

def _ref_forward(node_feats, edge_index, edge_feats, batch, num_graphs, params):
    atom_tables, bond_tables, blocks, lin2_w, lin2_b = params
    x = embed(atom_tables, node_feats)
    ea = embed(bond_tables, edge_feats)
    src, dst = edge_index[0], edge_index[1]
    for p in blocks:
        msg = jnp.maximum(x[src] + ea, 0.0)
        agg = jnp.zeros_like(x).at[dst].add(msg)
        h = (1.0 + p["eps"]) * x + agg
        z = h @ p["w1"] + p["b1"]
        z = (z - p["bn_mean"]) * jax.lax.rsqrt(p["bn_var"] + BN_EPS) * p["bn_gamma"] + p["bn_beta"]
        z = jnp.maximum(z, 0.0)
        h2 = z @ p["w2"] + p["b2"]
        mu = h2.mean(-1, keepdims=True)
        var = ((h2 - mu) ** 2).mean(-1, keepdims=True)
        x = jnp.maximum((h2 - mu) * jax.lax.rsqrt(var + LN_EPS) * p["ln_gamma"] + p["ln_beta"], 0.0)
    onehot_b = jax.nn.one_hot(batch, num_graphs, dtype=jnp.float32).T
    counts = jnp.maximum(onehot_b.sum(axis=1, keepdims=True), 1.0)
    pooled = (onehot_b / counts) @ x
    return pooled @ lin2_w + lin2_b


# ----------------------------- main --------------------------------------------

if __name__ == "__main__":
    N, E, D, C, B = 16, 32, 32, 8, 2            # nodes, edges, gconv_dim, out_channels, graphs
    NUM_LAYERS = 2

    key = jax.random.PRNGKey(0)
    k_param, k_x, k_e, k_src, k_dst = jax.random.split(key, 5)

    params = init_params(k_param, D, C, NUM_LAYERS)

    # synthetic graph batch (integer OGB-style features)
    node_feats = jnp.stack(
        [jax.random.randint(jax.random.fold_in(k_x, i), (N,), 0, v)
         for i, v in enumerate(ATOM_VOCABS)], axis=1).astype(jnp.int32)          # [N, 9]
    edge_feats = jnp.stack(
        [jax.random.randint(jax.random.fold_in(k_e, i), (E,), 0, v)
         for i, v in enumerate(BOND_VOCABS)], axis=1).astype(jnp.int32)          # [E, 3]
    src = jax.random.randint(k_src, (E,), 0, N)
    dst = jax.random.randint(k_dst, (E,), 0, N)
    edge_index = jnp.stack([src, dst], axis=0).astype(jnp.int32)                 # [2, E]
    batch = (jnp.arange(N) // (N // B)).astype(jnp.int32)                        # [N]

    out = graph_transformer_forward(node_feats, edge_index, edge_feats, batch, B, params)
    out = jax.block_until_ready(out)

    ref = _ref_forward(node_feats, edge_index, edge_feats, batch, B, params)
    assert out.shape == (B, C)
    assert jnp.allclose(out, ref, rtol=1e-3, atol=1e-4), "mismatch vs pure-JAX reference"

    print("KERNEL_OK")
</pallas_src>

<mosaic_0001>
module attributes {stable_mosaic.version = 11 : i64} {
  func.func @kernel(%arg0: i32, %arg1: memref<16x128xf32, #tpu.memory_space<vmem>>, %arg2: memref<32x128xf32, #tpu.memory_space<vmem>>, %arg3: memref<32x16xbf16, #tpu.memory_space<vmem>>, %arg4: memref<32x16xbf16, #tpu.memory_space<vmem>>, %arg5: memref<8x16xf32, #tpu.memory_space<vmem>>, %arg6: memref<128x128xf32, #tpu.memory_space<vmem>>, %arg7: memref<1x128xf32, #tpu.memory_space<vmem>>, %arg8: memref<4xf32, #tpu.memory_space<smem>>, %arg9: memref<1x128x128xf32, #tpu.memory_space<vmem>>, %arg10: memref<1x1x128xf32, #tpu.memory_space<vmem>>, %arg11: memref<1x128x128xf32, #tpu.memory_space<vmem>>, %arg12: memref<1x1x128xf32, #tpu.memory_space<vmem>>, %arg13: memref<1x1x128xf32, #tpu.memory_space<vmem>>, %arg14: memref<1x1x128xf32, #tpu.memory_space<vmem>>, %arg15: memref<8x128xf32, #tpu.memory_space<vmem>>, %arg16: memref<16x128xf32, #tpu.memory_space<vmem>>) attributes {dimension_semantics = [#tpu.dimension_semantics<arbitrary>], iteration_bounds = array<i64: 4>, scalar_prefetch = 0 : i64, scratch_operands = 1 : i64, tpu.core_type = #tpu.core_type<tc>, window_params = [{pipeline_mode = #tpu.pipeline_mode<synchronous>, transform_indices = @transform_0, window_bounds = array<i64: 16, 128>}, {pipeline_mode = #tpu.pipeline_mode<synchronous>, transform_indices = @transform_1, window_bounds = array<i64: 32, 128>}, {pipeline_mode = #tpu.pipeline_mode<synchronous>, transform_indices = @transform_2, window_bounds = array<i64: 32, 16>}, {pipeline_mode = #tpu.pipeline_mode<synchronous>, transform_indices = @transform_3, window_bounds = array<i64: 32, 16>}, {pipeline_mode = #tpu.pipeline_mode<synchronous>, transform_indices = @transform_4, window_bounds = array<i64: 8, 16>}, {pipeline_mode = #tpu.pipeline_mode<synchronous>, transform_indices = @transform_5, window_bounds = array<i64: 128, 128>}, {pipeline_mode = #tpu.pipeline_mode<synchronous>, transform_indices = @transform_6, window_bounds = array<i64: 1, 128>}, {transform_indices = @transform_7, window_bounds = array<i64: 4>}, {transform_indices = @transform_8, window_bounds = array<i64: 1, 128, 128>}, {transform_indices = @transform_9, window_bounds = array<i64: 1, 1, 128>}, {transform_indices = @transform_10, window_bounds = array<i64: 1, 128, 128>}, {transform_indices = @transform_11, window_bounds = array<i64: 1, 1, 128>}, {transform_indices = @transform_12, window_bounds = array<i64: 1, 1, 128>}, {transform_indices = @transform_13, window_bounds = array<i64: 1, 1, 128>}, {pipeline_mode = #tpu.pipeline_mode<synchronous>, transform_indices = @transform_14, window_bounds = array<i64: 8, 128>}]} {
    %c0_i32 = arith.constant 0 : i32
    %0 = arith.cmpi eq, %arg0, %c0_i32 : i32
    %1 = arith.extui %0 : i1 to i32
    %c0_i32_0 = arith.constant 0 : i32
    %2 = arith.cmpi ne, %1, %c0_i32_0 : i32
    scf.if %2 {
      %c0_41 = arith.constant 0 : index
      %c0_42 = arith.constant 0 : index
      %73 = vector.load %arg1[%c0_41, %c0_42] : memref<16x128xf32, #tpu.memory_space<vmem>>, vector<16x128xf32>
      %c0_43 = arith.constant 0 : index
      %c0_44 = arith.constant 0 : index
      %74 = vector.load %arg16[%c0_43, %c0_44] : memref<16x128xf32, #tpu.memory_space<vmem>>, vector<16x128xf32>
      tpu.vector_store %arg16[%c0_43, %c0_44], %73 {strides = array<i32>} : memref<16x128xf32, #tpu.memory_space<vmem>>, vector<16x128xf32>,
    } else {
    }
    %c0 = arith.constant 0 : index
    %c0_1 = arith.constant 0 : index
    %3 = vector.load %arg16[%c0, %c0_1] : memref<16x128xf32, #tpu.memory_space<vmem>>, vector<16x128xf32>
    %c0_2 = arith.constant 0 : index
    %c0_3 = arith.constant 0 : index
    %4 = vector.load %arg3[%c0_2, %c0_3] : memref<32x16xbf16, #tpu.memory_space<vmem>>, vector<32x16xbf16>
    %5 = arith.extf %4 : vector<32x16xbf16> to vector<32x16xf32>
    %c0_4 = arith.constant 0 : index
    %c0_5 = arith.constant 0 : index
    %6 = vector.load %arg4[%c0_4, %c0_5] : memref<32x16xbf16, #tpu.memory_space<vmem>>, vector<32x16xbf16>
    %7 = arith.extf %6 : vector<32x16xbf16> to vector<32x16xf32>
    %cst = arith.constant dense<0.000000e+00> : vector<32x128xf32>
    %8 = tpu.matmul %5, %3, %cst {dimension_numbers = #tpu.dot_dimension_numbers<[1], [0], [0], [1], [0, 0, 1, 1], [], []>} : vector<32x16xf32>, vector<16x128xf32>, vector<32x128xf32> -> vector<32x128xf32>
    %c0_6 = arith.constant 0 : index
    %c0_7 = arith.constant 0 : index
    %9 = vector.load %arg2[%c0_6, %c0_7] : memref<32x128xf32, #tpu.memory_space<vmem>>, vector<32x128xf32>
    %10 = arith.addf %8, %9 : vector<32x128xf32>
    %cst_8 = arith.constant 0.000000e+00 : f32
    %11 = vector.broadcast %cst_8 : f32 to vector<32x128xf32>
    %12 = arith.maximumf %10, %11 : vector<32x128xf32>
    %cst_9 = arith.constant dense<0.000000e+00> : vector<16x128xf32>
    %13 = tpu.matmul %7, %12, %cst_9 {dimension_numbers = #tpu.dot_dimension_numbers<[0], [0], [1], [1], [0, 1, 1, 1], [], []>} : vector<32x16xf32>, vector<32x128xf32>, vector<16x128xf32> -> vector<16x128xf32>
    %14 = arith.index_cast %arg0 : i32 to index
    %15 = memref.load %arg8[%14] : memref<4xf32, #tpu.memory_space<smem>>
    %cst_10 = arith.constant 1.000000e+00 : f32
    %16 = arith.addf %cst_10, %15 : f32
    %17 = vector.broadcast %16 : f32 to vector<16x128xf32>
    %18 = arith.mulf %17, %3 : vector<16x128xf32>
    %19 = arith.addf %18, %13 : vector<16x128xf32>
    %c0_11 = arith.constant 0 : index
    %c0_12 = arith.constant 0 : index
    %c0_13 = arith.constant 0 : index
    %20 = vector.load %arg9[%c0_11, %c0_12, %c0_13] : memref<1x128x128xf32, #tpu.memory_space<vmem>>, vector<1x128x128xf32>
    %21 = vector.shape_cast %20 : vector<1x128x128xf32> to vector<128x128xf32>
    %cst_14 = arith.constant dense<0.000000e+00> : vector<16x128xf32>
    %22 = tpu.matmul %19, %21, %cst_14 {dimension_numbers = #tpu.dot_dimension_numbers<[1], [0], [0], [1], [0, 0, 1, 1], [], []>} : vector<16x128xf32>, vector<128x128xf32>, vector<16x128xf32> -> vector<16x128xf32>
    %c0_15 = arith.constant 0 : index
    %c0_16 = arith.constant 0 : index
    %c0_17 = arith.constant 0 : index
    %23 = vector.load %arg10[%c0_15, %c0_16, %c0_17] : memref<1x1x128xf32, #tpu.memory_space<vmem>>, vector<1x1x128xf32>
    %24 = vector.shape_cast %23 : vector<1x1x128xf32> to vector<1x128xf32>
    %25 = vector.broadcast %24 : vector<1x128xf32> to vector<16x128xf32>
    %26 = arith.addf %22, %25 : vector<16x128xf32>
    %cst_18 = arith.constant 0.000000e+00 : f32
    %27 = vector.broadcast %cst_18 : f32 to vector<16x128xf32>
    %28 = arith.maximumf %26, %27 : vector<16x128xf32>
    %c0_19 = arith.constant 0 : index
    %c0_20 = arith.constant 0 : index
    %c0_21 = arith.constant 0 : index
    %29 = vector.load %arg11[%c0_19, %c0_20, %c0_21] : memref<1x128x128xf32, #tpu.memory_space<vmem>>, vector<1x128x128xf32>
    %30 = vector.shape_cast %29 : vector<1x128x128xf32> to vector<128x128xf32>
    %cst_22 = arith.constant dense<0.000000e+00> : vector<16x128xf32>
    %31 = tpu.matmul %28, %30, %cst_22 {dimension_numbers = #tpu.dot_dimension_numbers<[1], [0], [0], [1], [0, 0, 1, 1], [], []>} : vector<16x128xf32>, vector<128x128xf32>, vector<16x128xf32> -> vector<16x128xf32>
    %c0_23 = arith.constant 0 : index
    %c0_24 = arith.constant 0 : index
    %c0_25 = arith.constant 0 : index
    %32 = vector.load %arg12[%c0_23, %c0_24, %c0_25] : memref<1x1x128xf32, #tpu.memory_space<vmem>>, vector<1x1x128xf32>
    %33 = vector.shape_cast %32 : vector<1x1x128xf32> to vector<1x128xf32>
    %34 = vector.broadcast %33 : vector<1x128xf32> to vector<16x128xf32>
    %35 = arith.addf %31, %34 : vector<16x128xf32>
    %36 = tpu.iota {dimensions = array<i32: 1>} : vector<1x128xi32>
    %c32_i32 = arith.constant 32 : i32
    %37 = vector.broadcast %c32_i32 : i32 to vector<1x128xi32>
    %38 = arith.cmpi slt, %36, %37 : vector<1x128xi32>
    %39 = arith.extui %38 : vector<1x128xi1> to vector<1x128xi32>
    %40 = arith.sitofp %39 : vector<1x128xi32> to vector<1x128xf32>
    %cst_26 = arith.constant dense<0.000000e+00> : vector<16xf32>
    %41 = vector.multi_reduction <add>, %35, %cst_26 [1] : vector<16x128xf32> to vector<16xf32>
    %42 = vector.shape_cast %41 : vector<16xf32> to vector<16x1xf32>
    %cst_27 = arith.constant 3.125000e-02 : f32
    %43 = vector.broadcast %cst_27 : f32 to vector<16x1xf32>
    %44 = arith.mulf %42, %43 : vector<16x1xf32>
    %45 = vector.broadcast %44 : vector<16x1xf32> to vector<16x128xf32>
    %46 = arith.subf %35, %45 : vector<16x128xf32>
    %47 = arith.mulf %46, %46 : vector<16x128xf32>
    %48 = vector.broadcast %40 : vector<1x128xf32> to vector<16x128xf32>
    %49 = arith.mulf %47, %48 : vector<16x128xf32>
    %cst_28 = arith.constant dense<0.000000e+00> : vector<16xf32>
    %50 = vector.multi_reduction <add>, %49, %cst_28 [1] : vector<16x128xf32> to vector<16xf32>
    %51 = vector.shape_cast %50 : vector<16xf32> to vector<16x1xf32>
    %cst_29 = arith.constant 3.125000e-02 : f32
    %52 = vector.broadcast %cst_29 : f32 to vector<16x1xf32>
    %53 = arith.mulf %51, %52 : vector<16x1xf32>
    %cst_30 = arith.constant 9.99999974E-6 : f32
    %54 = vector.broadcast %cst_30 : f32 to vector<16x1xf32>
    %55 = arith.addf %53, %54 : vector<16x1xf32>
    %56 = math.rsqrt %55 : vector<16x1xf32>
    %57 = vector.broadcast %56 : vector<16x1xf32> to vector<16x128xf32>
    %58 = arith.mulf %46, %57 : vector<16x128xf32>
    %c0_31 = arith.constant 0 : index
    %c0_32 = arith.constant 0 : index
    %c0_33 = arith.constant 0 : index
    %59 = vector.load %arg13[%c0_31, %c0_32, %c0_33] : memref<1x1x128xf32, #tpu.memory_space<vmem>>, vector<1x1x128xf32>
    %60 = vector.shape_cast %59 : vector<1x1x128xf32> to vector<1x128xf32>
    %61 = vector.broadcast %60 : vector<1x128xf32> to vector<16x128xf32>
    %62 = arith.mulf %58, %61 : vector<16x128xf32>
    %c0_34 = arith.constant 0 : index
    %c0_35 = arith.constant 0 : index
    %c0_36 = arith.constant 0 : index
    %63 = vector.load %arg14[%c0_34, %c0_35, %c0_36] : memref<1x1x128xf32, #tpu.memory_space<vmem>>, vector<1x1x128xf32>
    %64 = vector.shape_cast %63 : vector<1x1x128xf32> to vector<1x128xf32>
    %65 = vector.broadcast %64 : vector<1x128xf32> to vector<16x128xf32>
    %66 = arith.addf %62, %65 : vector<16x128xf32>
    %cst_37 = arith.constant 0.000000e+00 : f32
    %67 = vector.broadcast %cst_37 : f32 to vector<16x128xf32>
    %68 = arith.maximumf %66, %67 : vector<16x128xf32>
    %c0_38 = arith.constant 0 : index
    %c0_39 = arith.constant 0 : index
    %69 = vector.load %arg16[%c0_38, %c0_39] : memref<16x128xf32, #tpu.memory_space<vmem>>, vector<16x128xf32>
    tpu.vector_store %arg16[%c0_38, %c0_39], %68 {strides = array<i32>} : memref<16x128xf32, #tpu.memory_space<vmem>>, vector<16x128xf32>,
    %c3_i32 = arith.constant 3 : i32
    %70 = arith.cmpi eq, %arg0, %c3_i32 : i32
    %71 = arith.extui %70 : i1 to i32
    %c0_i32_40 = arith.constant 0 : i32
    %72 = arith.cmpi ne, %71, %c0_i32_40 : i32
    scf.if %72 {
      %c0_41 = arith.constant 0 : index
      %c0_42 = arith.constant 0 : index
      %73 = vector.load %arg5[%c0_41, %c0_42] : memref<8x16xf32, #tpu.memory_space<vmem>>, vector<8x16xf32>
      %cst_43 = arith.constant dense<0.000000e+00> : vector<8x128xf32>
      %74 = tpu.matmul %73, %68, %cst_43 {dimension_numbers = #tpu.dot_dimension_numbers<[1], [0], [0], [1], [0, 0, 1, 1], [], []>} : vector<8x16xf32>, vector<16x128xf32>, vector<8x128xf32> -> vector<8x128xf32>
      %c0_44 = arith.constant 0 : index
      %c0_45 = arith.constant 0 : index
      %75 = vector.load %arg6[%c0_44, %c0_45] : memref<128x128xf32, #tpu.memory_space<vmem>>, vector<128x128xf32>
      %cst_46 = arith.constant dense<0.000000e+00> : vector<8x128xf32>
      %76 = tpu.matmul %74, %75, %cst_46 {dimension_numbers = #tpu.dot_dimension_numbers<[1], [0], [0], [1], [0, 0, 1, 1], [], []>} : vector<8x128xf32>, vector<128x128xf32>, vector<8x128xf32> -> vector<8x128xf32>
      %c0_47 = arith.constant 0 : index
      %c0_48 = arith.constant 0 : index
      %77 = vector.load %arg7[%c0_47, %c0_48] : memref<1x128xf32, #tpu.memory_space<vmem>>, vector<1x128xf32>
      %78 = vector.broadcast %77 : vector<1x128xf32> to vector<8x128xf32>
      %79 = arith.addf %76, %78 : vector<8x128xf32>
      %c0_49 = arith.constant 0 : index
      %c0_50 = arith.constant 0 : index
      %80 = vector.load %arg15[%c0_49, %c0_50] : memref<8x128xf32, #tpu.memory_space<vmem>>, vector<8x128xf32>
      tpu.vector_store %arg15[%c0_49, %c0_50], %79 {strides = array<i32>} : memref<8x128xf32, #tpu.memory_space<vmem>>, vector<8x128xf32>,
    } else {
    }
    return
  }
  func.func @transform_0(%arg0: i32) -> (i32, i32) {
    %c0_i32 = arith.constant 0 : i32
    %c0_i32_0 = arith.constant 0 : i32
    %c0_i32_1 = arith.constant 0 : i32
    return %c0_i32, %c0_i32_0 : i32, i32
  }
  func.func @transform_1(%arg0: i32) -> (i32, i32) {
    %c0_i32 = arith.constant 0 : i32
    %c0_i32_0 = arith.constant 0 : i32
    %c0_i32_1 = arith.constant 0 : i32
    return %c0_i32, %c0_i32_0 : i32, i32
  }
  func.func @transform_2(%arg0: i32) -> (i32, i32) {
    %c0_i32 = arith.constant 0 : i32
    %c0_i32_0 = arith.constant 0 : i32
    %c0_i32_1 = arith.constant 0 : i32
    return %c0_i32, %c0_i32_0 : i32, i32
  }
  func.func @transform_3(%arg0: i32) -> (i32, i32) {
    %c0_i32 = arith.constant 0 : i32
    %c0_i32_0 = arith.constant 0 : i32
    %c0_i32_1 = arith.constant 0 : i32
    return %c0_i32, %c0_i32_0 : i32, i32
  }
  func.func @transform_4(%arg0: i32) -> (i32, i32) {
    %c0_i32 = arith.constant 0 : i32
    %c0_i32_0 = arith.constant 0 : i32
    %c0_i32_1 = arith.constant 0 : i32
    return %c0_i32, %c0_i32_0 : i32, i32
  }
  func.func @transform_5(%arg0: i32) -> (i32, i32) {
    %c0_i32 = arith.constant 0 : i32
    %c0_i32_0 = arith.constant 0 : i32
    %c0_i32_1 = arith.constant 0 : i32
    return %c0_i32, %c0_i32_0 : i32, i32
  }
  func.func @transform_6(%arg0: i32) -> (i32, i32) {
    %c0_i32 = arith.constant 0 : i32
    %c0_i32_0 = arith.constant 0 : i32
    %c0_i32_1 = arith.constant 0 : i32
    return %c0_i32, %c0_i32_0 : i32, i32
  }
  func.func @transform_7(%arg0: i32) -> i32 {
    %c0_i32 = arith.constant 0 : i32
    %c0_i32_0 = arith.constant 0 : i32
    return %c0_i32 : i32
  }
  func.func @transform_8(%arg0: i32) -> (i32, i32, i32) {
    %c0_i32 = arith.constant 0 : i32
    %c0_i32_0 = arith.constant 0 : i32
    %c0_i32_1 = arith.constant 0 : i32
    return %arg0, %c0_i32, %c0_i32_0 : i32, i32, i32
  }
  func.func @transform_9(%arg0: i32) -> (i32, i32, i32) {
    %c0_i32 = arith.constant 0 : i32
    %c0_i32_0 = arith.constant 0 : i32
    %c0_i32_1 = arith.constant 0 : i32
    return %arg0, %c0_i32, %c0_i32_0 : i32, i32, i32
  }
  func.func @transform_10(%arg0: i32) -> (i32, i32, i32) {
    %c0_i32 = arith.constant 0 : i32
    %c0_i32_0 = arith.constant 0 : i32
    %c0_i32_1 = arith.constant 0 : i32
    return %arg0, %c0_i32, %c0_i32_0 : i32, i32, i32
  }
  func.func @transform_11(%arg0: i32) -> (i32, i32, i32) {
    %c0_i32 = arith.constant 0 : i32
    %c0_i32_0 = arith.constant 0 : i32
    %c0_i32_1 = arith.constant 0 : i32
    return %arg0, %c0_i32, %c0_i32_0 : i32, i32, i32
  }
  func.func @transform_12(%arg0: i32) -> (i32, i32, i32) {
    %c0_i32 = arith.constant 0 : i32
    %c0_i32_0 = arith.constant 0 : i32
    %c0_i32_1 = arith.constant 0 : i32
    return %arg0, %c0_i32, %c0_i32_0 : i32, i32, i32
  }
  func.func @transform_13(%arg0: i32) -> (i32, i32, i32) {
    %c0_i32 = arith.constant 0 : i32
    %c0_i32_0 = arith.constant 0 : i32
    %c0_i32_1 = arith.constant 0 : i32
    return %arg0, %c0_i32, %c0_i32_0 : i32, i32, i32
  }
  func.func @transform_14(%arg0: i32) -> (i32, i32) {
    %c0_i32 = arith.constant 0 : i32
    %c0_i32_0 = arith.constant 0 : i32
    %c0_i32_1 = arith.constant 0 : i32
    return %c0_i32, %c0_i32_0 : i32, i32
  }
}

</mosaic_0001>

<bundles_post_ra>
// kernel: tpu_custom_call.1
= control target key start
LH: loop header
LB: loop body
LE: loop exit
PB: predicated region body
PF: predicated region fallthrough
CT: control target
= control target key end

     0   :  { %s2028_s0 = inlined_call_operand.vmem [shape: f32[16,128], index: 0, kind: input, shape index: {}]   ;;  %s2029_s1 = inlined_call_operand.vmem [shape: f32[32,128], index: 1, kind: input, shape index: {}]   ;;  %s2030_s2 = inlined_call_operand.vmem [shape: bf16[32,16], index: 2, kind: input, shape index: {}]   ;;  %s2031_s3 = inlined_call_operand.vmem [shape: bf16[32,16], index: 3, kind: input, shape index: {}]   ;;  %s2032_s4 = inlined_call_operand.hbm [shape: f32[8,16], index: 4, kind: input, shape index: {}]   ;;  %s2033_s5 = inlined_call_operand.hbm [shape: f32[128,128], index: 5, kind: input, shape index: {}]   ;;  %s2034_s6 = inlined_call_operand.hbm [shape: f32[1,128], index: 6, kind: input, shape index: {}]   ;;  %s2035_s7 = inlined_call_operand.hbm [shape: f32[4], index: 7, kind: input, shape index: {}]   ;;  %s2036_s8 = inlined_call_operand.hbm [shape: f32[4,128,128], index: 8, kind: input, shape index: {}]   ;;  %s2037_s9 = inlined_call_operand.vmem [shape: f32[4,1,128], index: 9, kind: input, shape index: {}]   ;;  %s2038_s10 = inlined_call_operand.hbm [shape: f32[4,128,128], index: 10, kind: input, shape index: {}]   ;;  %s2039_s11 = inlined_call_operand.vmem [shape: f32[4,1,128], index: 11, kind: input, shape index: {}]   ;;  %s2040_s12 = inlined_call_operand.hbm [shape: f32[4,1,128], index: 12, kind: input, shape index: {}]   ;;  %s2041_s13 = inlined_call_operand.vmem [shape: f32[4,1,128], index: 13, kind: input, shape index: {}]   ;;  %s2042_s14 = inlined_call_operand.hbm [shape: f32[8,128], index: 14, kind: output, shape index: {}]  }
   0x1   :  { %2054 = sst [smem:[#allocation26_spill]] %s2028_s0 }
   0x2   :  { %2055 = sst [smem:[#allocation27_spill]] %s2029_s1 }
   0x3   :  { %2056 = sst [smem:[#allocation28_spill]] %s2030_s2 }
   0x4   :  { %2057 = sst [smem:[#allocation29_spill]] %s2031_s3 }
   0x5   :  { %2058 = sst [smem:[#allocation30_spill]] %s2033_s5 }
   0x6   :  { %2059 = sst [smem:[#allocation31_spill]] %s2036_s8 }
   0x7   :  { %2060 = sst [smem:[#allocation32_spill]] %s2039_s11 }
   0x8   :  { %2061 = sst [smem:[#allocation33_spill]] %s2041_s13 }
   0x9   :  { %2062 = sst [smem:[#allocation34_spill]] %s2042_s14 }
   0xa   :  { %19 = vsyncpa [#allocation4], 0 }
   0xb   :  { %20 = vsyncpa [#allocation8], 0 }
   0xc   :  { %21 = vsyncpa [#allocation6], 0 }
   0xd   :  { %22 = vsyncpa [#allocation12], 0 }
   0xe   :  { %24 = vsyncpa [#allocation12 + $0x1], 0 }
   0xf   :  { %25 = vsyncpa [#allocation15], 0 }
  0x10   :  { %27 = vsyncpa [#allocation15 + $0x1], 0 }
  0x11   :  { %28 = vsyncpa [#allocation5], 0  ;;  %s1710_s29 = smov 0   ;;  %s1712_s30 = smov 0  }
  0x12   :  { %s1714_s15 = smov 0   ;;  %s1716_s16 = smov 0  }
  0x13 LB: > { %2063 = sst [smem:[#allocation23_spill]] %s1621_s15  ;;  %s1729_s17 = sadd.s32 4294967295, %s1625_s16   ;;  %s1625_s16 = sphi %s1716_s16, %s2086_s16   ;;  %s1621_s15 = sphi %s1714_s15, %s2088_s15   ;;  %s1617_s30 = sphi %s1712_s30, %s2090_s30   ;;  %s1613_s29 = sphi %s1710_s29, %s2089_s29  }
  0x14   : > { %p222_p0 = scmp.ne.s32.totalorder %s1617_s30, %s1613_s29  ;;  %p223_p1 = scmp.eq.s32.totalorder %s1729_s17, 0 }
  0x15   : > { %p1186_p2 = scmp.ge.s32.totalorder %s1625_s16, 1  ;;  %p384_p3 = scmp.lt.s32.totalorder %s1625_s16, 5 }
  0x16   : > { %p1187_p4 = scmp.ne.s32.totalorder %s1729_s17, 0  ;;  %p1738_p5 = por %p223_p1, %p222_p0 }
  0x17   : > { %s2065_s5 = sld [smem:[#allocation30_spill]]  ;;  %p1745_p6 = pnand %p1186_p2, %p384_p3 }
  0x18   : > { %s1627_s23 = smov [#allocation7]   ;;  %s1758_s26 = sadd.s32 1, %s1625_s16  }
  0x19   : > { %p1265_p7 = pneg %p1745_p6  ;;  %s421_s24 = sshll.u32 %s1627_s23, 4  ;;  %s422_s24 = int_to_ptr.vmem [resolvable:$true] %s421_s24 }
  0x1a   : > { %2068 = sst [smem:[#allocation24_spill]] %s1758_s26  ;;  %s2046_s27 = smov 128  }
  0x1b   : > { %p1753_p8 = pnand %p1265_p7, %p223_p1  ;;  %s2048_s28 = smov 8  }
  0x1c   : > { %s206_s29 = ssub.s32 %s1625_s16, %s1758_s26  ;;  %s209_s19 = sadd.s32 1, %s1621_s15 }
  0x1d   : > { %s419_s21 = sshll.u32 %s2065_s5, 4  ;;  %p207_p9 = scmp.eq.s32.totalorder %s206_s29, 0  ;;  %s420_s21 = int_to_ptr.hbm [resolvable:$true] %s419_s21 }
  0x1e   : > { %1271 = dma.hbm_to_vmem [thread:$0]  (!%p1753_p8), %s420_s21, 2048, %s422_s24, [#allocation8], %s2046_s27, %s2046_s27, %s2048_s28  }
  0x1f   : > { %p216_p10 = scmp.ne.s32.totalorder %s1621_s15, %s1617_s30  ;;  %p217_p11 = scmp.eq.s32.totalorder %s1625_s16, 0 }
  0x20   : > { %p1292_p12 = scmp.lt.s32.totalorder %s1625_s16, 4  ;;  %s457_s23 = sand.u32 1, %s1625_s16  }
  0x21   : > { %s1773_s20 = scalar_select %p207_p9, %s1621_s15, %s209_s19  }
  0x22   : > { %p218_p13 = por %p217_p11, %p216_p10  ;;  %s1777_s5 = sand.u32 1, %s1621_s15  }
  0x23   : > { %2069 = sst [smem:[#allocation25_spill]] %s1773_s20  ;;  %s1192_s14 = sshll.u32 %s1777_s5, 7 }
  0x24   : > { %s1219_s1 = sshll.u32 %s1625_s16, 7  ;;  %s2070_s8 = sld [smem:[#allocation31_spill]] }
  0x25   : > { %s461_s27 = scalar_lea.vmem [#allocation11], %s1192_s14  ;;  %p1786_p0 = pnand %p1292_p12, %p218_p13 }
  0x26   : > { %s469_s29 = sshll.u32 %s461_s27, 4  ;;  %s494_s15 = scalar_lea.hbm %s2038_s10, %s1219_s1  ;;  %s470_s29 = int_to_ptr.vmem [resolvable:$true] %s469_s29 }
  0x27   : > { %s489_s26 = scalar_lea.vmem [#allocation13], %s1192_s14  ;;  %s495_s2 = sshll.u32 %s494_s15, 4  ;;  %s1812_s2 = int_to_ptr.hbm [resolvable:$true] %s495_s2 }
  0x28   : > { %s497_s0 = sshll.u32 %s489_s26, 4  ;;  %s1793_s3 = scalar_lea.sflag [#allocation12], %s457_s23  ;;  %s1814_s0 = int_to_ptr.vmem [resolvable:$true] %s497_s0 }
  0x29   : > { %p1382_p3 = pneg %p1786_p0 }
  0x2a   : > { %s466_s21 = scalar_lea.hbm %s2070_s8, %s1219_s1  ;;  %s1385_s20 = scalar_lea.hbm %s2070_s8, 512 }
  0x2b   : > { %s467_s24 = sshll.u32 %s466_s21, 4  ;;  %s468_s24 = int_to_ptr.hbm [resolvable:$true] %s467_s24 }
  0x2c   : > { %s1378_s21 = sshra.s32 %s468_s24, 4  ;;  %s1379_s21 = int_to_ptr.hbm [resolvable:$true] %s1378_s21 }
  0x2d   : > { %s1380_s27 = scalar_lea.hbm %s1379_s21, 128  ;;  %p1386_p10 = scmp.lt.s32.totalorder %s1379_s21, %s2070_s8 }
  0x2e   : > { %p1381_p2 = scmp.ne.s32.totalorder %s1379_s21, %s1380_s27  ;;  %p1387_p11 = scmp.lt.s32.totalorder %s1385_s20, %s1380_s27 }
  0x30   : > { %p1383_p7 = pnand %p1382_p3, %p1381_p2  ;;  %p1388_p12 = por %p1387_p11, %p1386_p10 }
  0x32   : > { %p1384_p9 = pneg %p1383_p7 }
  0x34   : > { %p1389_p13 = pnand %p1388_p12, %p1384_p9 }
  0x36   : > { %1392 = shalt.err (!%p1389_p13)
}
  0x37   : > { %s2072_s15 = smov 8   ;;  %s2073_s26 = smov 128  }
  0x38   : > { %1281 = dma.hbm_to_vmem [thread:$0]  (!%p1786_p0), %s468_s24, 2048, %s470_s29, %s1793_s3, %s2073_s26, %s2073_s26, %s2072_s15  }
  0x39   : > { %s408_s21 = sshll.u32 %s2032_s4, 4  ;;  %s1630_s27 = smov [#allocation3]   ;;  %s409_s21 = int_to_ptr.hbm [resolvable:$true] %s408_s21 }
  0x3a   : > { %s410_s28 = sshll.u32 %s1630_s27, 4  ;;  %s434_s24 = sshll.u32 %s2034_s6, 4  ;;  %s411_s28 = int_to_ptr.vmem [resolvable:$true] %s410_s28  ;;  %s435_s24 = int_to_ptr.hbm [resolvable:$true] %s434_s24 }
  0x3b   : > { %1268 = dma.hbm_to_vmem [thread:$0]  (!%p1753_p8), %s409_s21, 128, %s411_s28, [#allocation4]  }
  0x3c   : > { %s1631_s29 = smov [#allocation9]   ;;  %s446_s13 = sshll.u32 %s2035_s7, 4  ;;  %s447_s13 = int_to_ptr.hbm [resolvable:$true] %s446_s13 }
  0x3d   : > { %s436_s14 = sshll.u32 %s1631_s29, 4  ;;  %s1632_s23 = smov [#allocation10]   ;;  %s437_s14 = int_to_ptr.vmem [resolvable:$true] %s436_s14 }
  0x3e   : > { %1274 = dma.hbm_to_vmem [thread:$0]  (!%p1753_p8), %s435_s24, 16, %s437_s14, [#allocation8]  }
  0x3f   : > { %1277 = dma.hbm_to_smem (!%p1753_p8), %s447_s13, 16, %s1632_s23, [#allocation6]  }
  0x40   : > { %s1483_s27 = sshra.s32 %s1812_s2, 4  ;;  %s1490_s8 = scalar_lea.hbm %s2038_s10, 512  ;;  %s1484_s27 = int_to_ptr.hbm [resolvable:$true] %s1483_s27 }
  0x41   : > { %s1485_s20 = scalar_lea.hbm %s1484_s27, 128  ;;  %p1491_p10 = scmp.lt.s32.totalorder %s1484_s27, %s2038_s10 }
  0x42   : > { %p1486_p2 = scmp.ne.s32.totalorder %s1484_s27, %s1485_s20  ;;  %p1492_p11 = scmp.lt.s32.totalorder %s1490_s8, %s1485_s20 }
  0x44   : > { %p1488_p7 = pnand %p1486_p2, %p1382_p3  ;;  %p1493_p12 = por %p1492_p11, %p1491_p10 }
  0x46   : > { %p1489_p9 = pneg %p1488_p7 }
  0x48   : > { %p1494_p13 = pnand %p1493_p12, %p1489_p9 }
  0x4a   : > { %1497 = shalt.err (!%p1494_p13)
}
  0x4b   : > { %1284 = dma.hbm_to_vmem [thread:$0]  (!%p1786_p0), %s1812_s2, 2048, %s1814_s0, %s1793_s3, %s2073_s26, %s2073_s26, %s2072_s15  }
  0x4c   : > { %s519_s29 = scalar_lea.hbm %s2040_s12, %s1625_s16  ;;  %s516_s13 = scalar_lea.vmem [#allocation14], %s1777_s5 }
  0x4d   : > { %s521_s14 = sshll.u32 %s519_s29, 4  ;;  %s523_s23 = sshll.u32 %s516_s13, 4  ;;  %s522_s14 = int_to_ptr.hbm [resolvable:$true] %s521_s14  ;;  %s524_s23 = int_to_ptr.vmem [resolvable:$true] %s523_s23 }
  0x4e   : > { %s514_s27 = scalar_lea.sflag [#allocation15], %s1777_s5  ;;  %s1513_s20 = sshra.s32 %s522_s14, 4  ;;  %s1514_s20 = int_to_ptr.hbm [resolvable:$true] %s1513_s20 }
  0x4f   : > { %s1515_s21 = scalar_lea.hbm %s1514_s20, 1  ;;  %s1520_s2 = scalar_lea.hbm %s2040_s12, 4 }
  0x50   : > { %p1516_p8 = scmp.ne.s32.totalorder %s1514_s20, %s1515_s21  ;;  %p1521_p9 = scmp.lt.s32.totalorder %s1514_s20, %s2040_s12 }
  0x51   : > { %p1522_p10 = scmp.lt.s32.totalorder %s1520_s2, %s1515_s21 }
  0x52   : > { %p1518_p2 = pnand %p1516_p8, %p1382_p3 }
  0x53   : > { %p1523_p11 = por %p1522_p10, %p1521_p9 }
  0x54   : > { %p1519_p7 = pneg %p1518_p2 }
  0x56   : > { %p1524_p12 = pnand %p1523_p11, %p1519_p7 }
  0x58   : > { %1527 = shalt.err (!%p1524_p12)
}
  0x59   : > { %1287 = dma.hbm_to_vmem [thread:$0]  (!%p1786_p0), %s522_s14, 16, %s524_s23, %s514_s27  }
  0x5a   : > { %538 = sbr.rel (%p1745_p6) target bundleno = 1241 (0x4d9), region = 76 }
  0x5f   : > { %1588 = dma.done.wait (%p223_p1), [#allocation4], 128  }
  0x60   : > { %1590 = vsyncadd (%p223_p1), [#allocation4], 4294967168 }
  0x61   : > { %1592 = dma.done.wait (%p223_p1), [#allocation8], 2064  }
  0x62   : > { %1594 = vsyncadd (%p223_p1), [#allocation8], 4294965232 }
  0x63   : > { %1596 = dma.done.wait (%p223_p1), [#allocation6], 16  }
  0x64   : > { %1598 = vsyncadd (%p223_p1), [#allocation6], 4294967280  ;;  %s560_s5 = sand.u32 1, %s1729_s17   ;;  %s1882_s22 = sand.u32 1, %s1617_s30  }
  0x65   : > { %s1203_s19 = sshll.u32 %s1882_s22, 7  ;;  %s561_s15 = scalar_lea.sflag [#allocation12], %s560_s5 }
  0x66   : > { %s1885_s26 = scalar_lea.vmem [#allocation11], %s1203_s19 }
  0x67   : > { %1600 = dma.done.wait (%p1738_p5), %s561_s15, 4096  }
  0x68   : > { %1602 = vsyncadd (%p1738_p5), %s561_s15, 4294963200  ;;  %s1891_s8 = scalar_lea.vmem [#allocation13], %s1203_s19  ;;  %s581_s11 = scalar_lea.sflag [#allocation15], %s1882_s22 }
  0x69   : > { %s583_s1 = scalar_lea.vmem [#allocation14], %s1882_s22 }
  0x6a   : > { %1604 = dma.done.wait (%p1738_p5), %s581_s11, 16  }
  0x6b   : > { %1606 = vsyncadd (%p1738_p5), %s581_s11, 4294967280 }
  0x6c   : > { %589 = sfence }
  0x6d   : > { %p643_p1 = scmp.lt.s32.totalorder %s1729_s17, 3  ;;  %s2074_s27 = sld [smem:[#allocation32_spill]] }
  0x6e   : > { %s2075_s28 = sld [smem:[#allocation33_spill]] }
  0x6f   : > { %s1901_s25 = scalar_select %p643_p1, %s1729_s17, 3 }
  0x70   : > { %655 = sbr.rel (%p1187_p4) target bundleno = 121 (0x79), region = 108  ;;  %s2076_s16 = sld [smem:[#allocation26_spill]] (!%p1187_p4) }
  0x71   : > { %s645_s14 = scalar_lea.vmem %s2037_s9, %s1901_s25 }
  0x73   : > { %s648_s20 = scalar_lea.vmem %s2074_s27, %s1901_s25 }
  0x74   : > { %s651_s0 = scalar_lea.vmem %s2075_s28, %s1901_s25 }
  0x76   : > { %s2077_s5 = smov %s2076_s16  ;;  %v656_v0 = vld [vmem:[%s2076_s16] sm:$0xff] }
  0x77   : > { %v657_v1 = vld [vmem:[%s2077_s5 + $0x8] sm:$0xff]  ;;  %658 = vst [vmem:[#allocation2] sm:$0xff] %v656_v0 }
  0x78   : > { %659 = vst [vmem:[#allocation2 + $0x8] sm:$0xff] %v657_v1 }
  0x79 PF: > { %s2078_s29 = sld [smem:[#allocation29_spill]]  ;;  %vm682_vm0 = vcmask 130048   ;;  %v812_v18 = vld [vmem:[%s1885_s26 + $0x78] sm:$0xff]  ;;  %v811_v19 = vld [vmem:[%s1885_s26 + $0x70] sm:$0xff]  ;;  %v810_v21 = vld [vmem:[%s1885_s26 + $0x68] sm:$0xff]  ;;  %vm760_vm1 = vcmask 261120  }
  0x7a   : > { %s2080_s21 = sld [smem:[#allocation28_spill]]  ;;  %817 = vmatpush.msra.mxu2 %v812_v18  ;;  %v809_v22 = vld [vmem:[%s1885_s26 + $0x60] sm:$0xff]  ;;  %v808_v23 = vld [vmem:[%s1885_s26 + $0x58] sm:$0xff]  ;;  %v807_v26 = vld [vmem:[%s1885_s26 + $0x50] sm:$0xff]  ;;  %p1213_p4 = scmp.ne.s32.totalorder %s1729_s17, 3 }
  0x7b   : > { %s2081_s15 = sld [smem:[#allocation27_spill]]  ;;  %v806_v31 = vld [vmem:[%s1885_s26 + $0x48] sm:$0xff]  ;;  %v805_v35 = vld [vmem:[%s1885_s26 + $0x40] sm:$0xff]  ;;  %v804_v38 = vld [vmem:[%s1885_s26 + $0x38] sm:$0xff] }
  0x7c   : > { %818 = vmatpush.msra.mxu2 %v811_v19  ;;  %v803_v40 = vld [vmem:[%s1885_s26 + $0x30] sm:$0xff]  ;;  %v802_v42 = vld [vmem:[%s1885_s26 + $0x28] sm:$0xff]  ;;  %v801_v43 = vld [vmem:[%s1885_s26 + $0x20] sm:$0xff]  ;;  %s790_s2 = sld [smem:[#allocation10 + %s1729_s17]] }
  0x7d   : > { %v800_v44 = vld [vmem:[%s1885_s26 + $0x18] sm:$0xff]  ;;  %v799_v46 = vld [vmem:[%s1885_s26 + $0x10] sm:$0xff]  ;;  %v798_v48 = vld [vmem:[%s1885_s26 + $0x8] sm:$0xff] }
  0x7e   : > { %v1928_v4 = vld [vmem:[#allocation2] sm:$0xff]  ;;  %819 = vmatpush.msra.mxu2 %v810_v21  ;;  %v857_v50 = vld [vmem:[%s1891_s8 + $0x78] sm:$0xff]  ;;  %v856_v51 = vld [vmem:[%s1891_s8 + $0x70] sm:$0xff]  ;;  %v885_v21 = vlaneseq }
  0x7f   : > { %v1923_v2 = vld [vmem:[#allocation2 + $0x8] sm:$0xff]  ;;  %s2079_s13 = smov %s2078_s29  ;;  %v1230_v3 = vld [vmem:[%s2078_s29] sm:$0xff]   ;;  %862 = vmatpush.msra.mxu3 %v857_v50  ;;  %v853_v54 = vld [vmem:[%s1891_s8 + $0x58] sm:$0xff] }
  0x80   : > { %709 = vmatpush.msra.mxu0 %v1923_v2  ;;  %v1231_v5 = vunpack.c.l.bf16 %v1230_v3  ;;  %v1222_v6 = vld [vmem:[%s2080_s21] sm:$0xff]   ;;  %v1232_v8 = vunpack.c.h.bf16 %v1230_v3  ;;  %v1238_v10 = vld [vmem:[%s2079_s13 + $0x8] sm:$0xff]   ;;  %820 = vmatpush.msra.mxu2 %v809_v22  ;;  %v849_v58 = vld [vmem:[%s1891_s8 + $0x38] sm:$0xff]  ;;  %v886_v22 = vand.u32 127, %v885_v21 }
  0x81   : > { %v1223_v7 = vunpack.c.l.bf16 %v1222_v6  ;;  %v1224_v9 = vunpack.c.h.bf16 %v1222_v6  ;;  %v1237_v11 = vld [vmem:[%s2080_s21 + $0x8] sm:$0xff]   ;;  %v1235_v12 = vunpack.c.l.bf16 %v1238_v10  ;;  %v1236_v14 = vunpack.c.h.bf16 %v1238_v10  ;;  %s2082_s11 = smov %s2081_s15  ;;  %v680_v24 = vld [vmem:[%s2081_s15 + $0x10] sm:$0xff]  ;;  %v797_v49 = vld [vmem:[%s1885_s26] sm:$0xff]  ;;  %863 = vmatpush.msra.mxu3 %v856_v51 }
  0x82   : > { %728 = vxpose.xlu0.b32.start [1/4] (short) (narrow) %v1231_v5, 16  ;;  %710 = vmatpush.msra.mxu0 %v1928_v4  ;;  %v1227_v13 = vunpack.c.l.bf16 %v1237_v11  ;;  %v1228_v15 = vunpack.c.h.bf16 %v1237_v11  ;;  %v681_v25 = vld [vmem:[%s2082_s11 + $0x18] sm:$0xff]  ;;  %v679_v27 = vld [vmem:[%s2082_s11 + $0x8] sm:$0xff]  ;;  %v678_v32 = vld [vmem:[%s2082_s11] sm:$0xff]  ;;  %s791_s26 = sadd.f32 1.0, %s790_s2  ;;  %vm887_vm2 = vcmp.lt.s32.totalorder %v886_v22, 32 }
  0x83   : > { %1206 = vmatmul.msk.f32.vlgmr.msra.gmra.mxu0 %vm682_vm0, %v1223_v7  ;;  %821 = vmatpush.msra.mxu2 %v808_v23  ;;  %v855_v52 = vld [vmem:[%s1891_s8 + $0x68] sm:$0xff]  ;;  %v854_v53 = vld [vmem:[%s1891_s8 + $0x60] sm:$0xff]  ;;  %v852_v55 = vld [vmem:[%s1891_s8 + $0x50] sm:$0xff] }
  0x84   : > { %864 = vmatpush.msra.mxu3 %v855_v52  ;;  %v851_v56 = vld [vmem:[%s1891_s8 + $0x48] sm:$0xff]  ;;  %v850_v57 = vld [vmem:[%s1891_s8 + $0x40] sm:$0xff]  ;;  %v792_v59 = vstv %s791_s26  ;;  %v848_v60 = vld [vmem:[%s1891_s8 + $0x30] sm:$0xff] }
  0x85   : > { %822 = vmatpush.msra.mxu2 %v807_v26  ;;  %v793_v61 = vmul.f32 %v792_v59, %v1928_v4  ;;  %v847_v62 = vld [vmem:[%s1891_s8 + $0x28] sm:$0xff]  ;;  %v846_v63 = vld [vmem:[%s1891_s8 + $0x20] sm:$0xff]  ;;  %v845_v3 = vld [vmem:[%s1891_s8 + $0x18] sm:$0xff]  ;;  %v794_v5 = vmul.f32 %v792_v59, %v1923_v2  ;;  %v1633_v26 = vmov 0.0  }
  0x86   : > { %865 = vmatpush.msra.mxu3 %v854_v53  ;;  %v844_v4 = vld [vmem:[%s1891_s8 + $0x10] sm:$0xff]  ;;  %v1339_v10 = vld [vmem:[%s645_s14] ss:$0 sm:$0xff] }
  0x87   : > { %823 = vmatpush.msra.mxu2 %v806_v31  ;;  %v1342_v52 = vld [vmem:[%s651_s0] ss:$0 sm:$0xff] }
  0x88   : > { %866 = vmatpush.msra.mxu3 %v853_v54 }
  0x89   : > { %824 = vmatpush.msra.mxu2 %v805_v35 }
  0x8a   : > { %729 = vxpose.xlu0.b32.cont [2/4] (short) (narrow) %v1232_v8, 16  ;;  %867 = vmatpush.msra.mxu3 %v852_v55  ;;  %v843_v8 = vld [vmem:[%s1891_s8 + $0x8] sm:$0xff] }
  0x8b   : > { %1207 = vmatmul.msk.f32.gmra.mxu0 %vm682_vm0, %v1224_v9  ;;  %825 = vmatpush.msra.mxu2 %v804_v38  ;;  %v842_v9 = vld [vmem:[%s1891_s8] sm:$0xff] }
  0x8c   : > { %868 = vmatpush.msra.mxu3 %v851_v56 }
  0x8d   : > { %826 = vmatpush.msra.mxu2 %v803_v40 }
  0x8e   : > { %869 = vmatpush.msra.mxu3 %v850_v57 }
  0x8f   : > { %827 = vmatpush.msra.mxu2 %v802_v42 }
  0x90   : > { %870 = vmatpush.msra.mxu3 %v849_v58 }
  0x91   : > { %828 = vmatpush.msra.mxu2 %v801_v43 }
  0x92   : > { %730 = vxpose.xlu0.b32.cont [3/4] (short) (narrow) %v1235_v12, 16  ;;  %871 = vmatpush.msra.mxu3 %v848_v60 }
  0x93   : > { %1208 = vmatmul.msk.f32.gmra.mxu0 %vm682_vm0, %v1227_v13  ;;  %829 = vmatpush.msra.mxu2 %v800_v44 }
  0x94   : > { %872 = vmatpush.msra.mxu3 %v847_v62 }
  0x95   : > { %830 = vmatpush.msra.mxu2 %v799_v46 }
  0x96   : > { %873 = vmatpush.msra.mxu3 %v846_v63 }
  0x97   : > { %831 = vmatpush.msra.mxu2 %v798_v48 }
  0x98   : > { %874 = vmatpush.msra.mxu3 %v845_v3 }
  0x99   : > { %832 = vmatpush.msra.mxu2 %v797_v49  ;;  %v1341_v49 = vld [vmem:[%s583_s1] ss:$0 sm:$0xff] }
  0x9a   : > { %731 = vxpose.xlu0.b32.end [4/4] (short) (narrow) %v1236_v14, 16  ;;  %875 = vmatpush.msra.mxu3 %v844_v4 }
  0x9b   : > { %1209 = vmatmul.msk.f32.gmra.mxu0 %vm682_vm0, %v1228_v15 }
  0x9c   : > { %876 = vmatpush.msra.mxu3 %v843_v8 }
  0x9e   : > { %877 = vmatpush.msra.mxu3 %v842_v9 }
 0x100   : > { %v712_v16 = vpop.f32.mrf.mxu0 }
 0x101   : > { %v713_v36 = vadd.f32 %v712_v16, %v678_v32  ;;  %v1340_v16 = vld [vmem:[%s648_s20] ss:$0 sm:$0xff] }
 0x103   : > { %v724_v41 = vmax.f32 %v713_v36, 0.0 }
 0x108   : > { %v715_v17 = vpop.f32.mrf.mxu0 }
 0x109   : > { %v716_v33 = vadd.f32 %v715_v17, %v679_v27  ;;  %v1212_v27 = vsel %vm887_vm2, 1.0, %v1633_v26 }
 0x10b   : > { %v725_v39 = vmax.f32 %v716_v33, 0.0 }
 0x110   : > { %v718_v20 = vpop.f32.mrf.mxu0 }
 0x111   : > { %v719_v29 = vadd.f32 %v718_v20, %v680_v24 }
 0x113   : > { %v726_v37 = vmax.f32 %v719_v29, 0.0 }
 0x118   : > { %v721_v28 = vpop.f32.mrf.mxu0 }
 0x119   : > { %v722_v30 = vadd.f32 %v721_v28, %v681_v25 }
 0x11b   : > { %v727_v34 = vmax.f32 %v722_v30, 0.0 }
 0x11d   : > { %779 = vmatpush.msra.mxu1 %v727_v34 }
 0x11f   : > { %780 = vmatpush.msra.mxu1 %v726_v37 }
 0x121   : > { %781 = vmatpush.msra.mxu1 %v725_v39 }
 0x123   : > { %782 = vmatpush.msra.mxu1 %v724_v41 }
 0x126   : > { %v744_v45 = vpop.trf.xlu0 }
 0x127   : > { %1210 = vmatmul.msk.f32.vlgmr.msra.gmra.mxu1 %vm760_vm1, %v744_v45 }
 0x12e   : > { %v745_v47 = vpop.trf.xlu0 }
 0x12f   : > { %1211 = vmatmul.msk.f32.gmra.mxu1 %vm760_vm1, %v745_v47 }
 0x1a4   : > { %v784_v0 = vpop.f32.mrf.mxu1 }
 0x1a5   : > { %v795_v1 = vadd.f32 %v793_v61, %v784_v0 }
 0x1a7   : > { %833 = vmatmul.f32.vlgmr.msra.gmra.mxu2 %v795_v1 }
 0x1ac   : > { %v787_v6 = vpop.f32.mrf.mxu1 }
 0x1ad   : > { %v796_v7 = vadd.f32 %v794_v5, %v787_v6 }
 0x1af   : > { %836 = vmatmul.f32.gmra.mxu2 %v796_v7 }
 0x22a   : > { %v834_v11 = vpop.f32.mrf.mxu2 }
 0x22b   : > { %v835_v12 = vadd.f32 %v1339_v10, %v834_v11 }
 0x22d   : > { %v840_v13 = vmax.f32 %v835_v12, 0.0 }
 0x22f   : > { %878 = vmatmul.f32.vlgmr.msra.gmra.mxu3 %v840_v13 }
 0x232   : > { %v837_v2 = vpop.f32.mrf.mxu2 }
 0x233   : > { %v838_v14 = vadd.f32 %v1339_v10, %v837_v2 }
 0x235   : > { %v841_v15 = vmax.f32 %v838_v14, 0.0 }
 0x237   : > { %881 = vmatmul.f32.gmra.mxu3 %v841_v15 }
 0x2b2   : > { %v879_v17 = vpop.f32.mrf.mxu3 }
 0x2b3   : > { %v880_v18 = vadd.f32 %v1340_v16, %v879_v17 }
 0x2b5   : > { %890 = vadd.xlane.f32.xlu1 %v880_v18 }
 0x2ba   : > { %v882_v19 = vpop.f32.mrf.mxu3 }
 0x2bb   : > { %v883_v20 = vadd.f32 %v1340_v16, %v882_v19 }
 0x2bd   : > { %892 = vadd.xlane.f32.xlu1 %v883_v20 }
 0x328   : > { %v891_v23 = vpop.xlane.xlu1 %890 }
 0x329   : > { %v894_v24 = vmul.f32 0.03125, %v891_v23 }
 0x32b   : > { %v896_v25 = vsub.f32 %v880_v18, %v894_v24 }
 0x32d   : > { %v898_v28 = vmul.f32 %v896_v25, %v896_v25 }
 0x32f   : > { %v900_v29 = vmul.f32 %v1212_v27, %v898_v28 }
 0x330   : > { %v893_v30 = vpop.xlane.xlu1 %892 }
 0x331   : > { %v895_v31 = vmul.f32 0.03125, %v893_v30  ;;  %902 = vadd.xlane.f32.xlu2 %v900_v29 }
 0x333   : > { %v897_v32 = vsub.f32 %v883_v20, %v895_v31 }
 0x335   : > { %v899_v33 = vmul.f32 %v897_v32, %v897_v32 }
 0x337   : > { %v901_v34 = vmul.f32 %v1212_v27, %v899_v33 }
 0x339   : > { %904 = vadd.xlane.f32.xlu2 %v901_v34 }
 0x3a4   : > { %v903_v35 = vpop.xlane.xlu2 %902 }
 0x3a5   : > { %v906_v36 = vmul.f32 0.03125, %v903_v35 }
 0x3a7   : > { %v908_v37 = vadd.f32 1e-05, %v906_v36 }
 0x3a9   : > { %1343 = vrsqrt.f32 %v908_v37  ;;  %vm916_vm4 = vweird.f32 %v908_v37 }
 0x3ac   : > { %v905_v38 = vpop.xlane.xlu2 %904 }
 0x3ad   : > { %v907_v39 = vmul.f32 0.03125, %v905_v38 }
 0x3af   : > { %v1344_v40 = vpop.eup %1343  ;;  %v909_v41 = vadd.f32 1e-05, %v907_v39 }
 0x3b0   : > { %v911_v42 = vmul.f32 %v1344_v40, %v908_v37  ;;  %vm917_vm3 = vweird.f32 %v1344_v40 }
 0x3b1   : > { %1345 = vrsqrt.f32 %v909_v41  ;;  %vm918_vm5 = vmor %vm916_vm4, %vm917_vm3  ;;  %vm926_vm7 = vweird.f32 %v909_v41 }
 0x3b2   : > { %v912_v43 = vmul.f32 %v1344_v40, %v911_v42 }
 0x3b4   : > { %v913_v44 = vmul.f32 0.5, %v912_v43 }
 0x3b6   : > { %v914_v45 = vsub.f32 1.5, %v913_v44 }
 0x3b7   : > { %v1346_v46 = vpop.eup %1345 }
 0x3b8   : > { %v915_v47 = vmul.f32 %v1344_v40, %v914_v45  ;;  %v921_v48 = vmul.f32 %v1346_v46, %v909_v41  ;;  %vm927_vm6 = vweird.f32 %v1346_v46 }
 0x3b9   : > { %vm928_vm8 = vmor %vm926_vm7, %vm927_vm6 }
 0x3ba   : > { %v919_v50 = vsel %vm918_vm5, %v1344_v40, %v915_v47  ;;  %v922_v51 = vmul.f32 %v1346_v46, %v921_v48 }
 0x3bb   : > { %v930_v53 = vmul.f32 %v919_v50, %v896_v25 }
 0x3bc   : > { %v923_v54 = vmul.f32 0.5, %v922_v51 }
 0x3bd   : > { %v936_v55 = vmul.f32 %v1341_v49, %v930_v53 }
 0x3be   : > { %v924_v56 = vsub.f32 1.5, %v923_v54 }
 0x3bf   : > { %v942_v57 = vadd.f32 %v1342_v52, %v936_v55 }
 0x3c0   : > { %v925_v58 = vmul.f32 %v1346_v46, %v924_v56 }
 0x3c1   : > { %v944_v59 = vmax.f32 %v942_v57, 0.0 }
 0x3c2   : > { %v929_v60 = vsel %vm928_vm8, %v1346_v46, %v925_v58 }
 0x3c3   : > { %946 = vst [vmem:[#allocation2] sm:$0xff] %v944_v59  ;;  %v931_v61 = vmul.f32 %v929_v60, %v897_v32 }
 0x3c5   : > { %v937_v62 = vmul.f32 %v1341_v49, %v931_v61 }
 0x3c7   : > { %v943_v63 = vadd.f32 %v1342_v52, %v937_v62  ;;  %951 = sbr.rel (%p1213_p4) target bundleno = 1230 (0x4ce), region = 112 }
 0x3c9   : > { %v945_v0 = vmax.f32 %v943_v63, 0.0 }
 0x3cb   : > { %947 = vst [vmem:[#allocation2 + $0x8] sm:$0xff] %v945_v0 }
 0x3cc   : > { %970 = vmatpush.msra.mxu0 %v945_v0  ;;  %v952_v1 = vld [vmem:[#allocation3] sm:$0xff]  ;;  %v990_v5 = vld [vmem:[#allocation7 + $0x70] sm:$0xff]  ;;  %v989_v6 = vld [vmem:[#allocation7 + $0x68] sm:$0xff] }
 0x3cd   : > { %v991_v3 = vld [vmem:[#allocation7 + $0x78] sm:$0xff]  ;;  %v988_v7 = vld [vmem:[#allocation7 + $0x60] sm:$0xff]  ;;  %v986_v8 = vld [vmem:[#allocation7 + $0x50] sm:$0xff] }
 0x3ce   : > { %996 = vmatpush.msra.mxu1 %v991_v3  ;;  %971 = vmatpush.msra.mxu0 %v944_v59  ;;  %v987_v4 = vld [vmem:[#allocation7 + $0x58] sm:$0xff]  ;;  %v985_v9 = vld [vmem:[#allocation7 + $0x48] sm:$0xff]  ;;  %v984_v10 = vld [vmem:[#allocation7 + $0x40] sm:$0xff] }
 0x3cf   : > { %1214 = vmatmul.msk.f32.vlgmr.msra.gmra.mxu0 %vm682_vm0, %v952_v1  ;;  %v983_v11 = vld [vmem:[#allocation7 + $0x38] sm:$0xff]  ;;  %v982_v12 = vld [vmem:[#allocation7 + $0x30] sm:$0xff]  ;;  %v981_v13 = vld [vmem:[#allocation7 + $0x28] sm:$0xff] }
 0x3d0   : > { %997 = vmatpush.msra.mxu1 %v990_v5  ;;  %v980_v2 = vld [vmem:[#allocation7 + $0x20] sm:$0xff]  ;;  %v979_v14 = vld [vmem:[#allocation7 + $0x18] sm:$0xff]  ;;  %v978_v15 = vld [vmem:[#allocation7 + $0x10] sm:$0xff] }
 0x3d1   : > { %v977_v16 = vld [vmem:[#allocation7 + $0x8] sm:$0xff]  ;;  %v976_v17 = vld [vmem:[#allocation7] sm:$0xff] }
 0x3d2   : > { %998 = vmatpush.msra.mxu1 %v989_v6  ;;  %v1347_v19 = vld [vmem:[#allocation9] ss:$0 sm:$0xff] }
 0x3d4   : > { %999 = vmatpush.msra.mxu1 %v988_v7 }
 0x3d6   : > { %1000 = vmatpush.msra.mxu1 %v987_v4 }
 0x3d8   : > { %1001 = vmatpush.msra.mxu1 %v986_v8 }
 0x3da   : > { %1002 = vmatpush.msra.mxu1 %v985_v9 }
 0x3dc   : > { %1003 = vmatpush.msra.mxu1 %v984_v10 }
 0x3de   : > { %1004 = vmatpush.msra.mxu1 %v983_v11 }
 0x3e0   : > { %1005 = vmatpush.msra.mxu1 %v982_v12 }
 0x3e2   : > { %1006 = vmatpush.msra.mxu1 %v981_v13 }
 0x3e4   : > { %1007 = vmatpush.msra.mxu1 %v980_v2 }
 0x3e6   : > { %1008 = vmatpush.msra.mxu1 %v979_v14 }
 0x3e8   : > { %1009 = vmatpush.msra.mxu1 %v978_v15 }
 0x3ea   : > { %1010 = vmatpush.msra.mxu1 %v977_v16 }
 0x3ec   : > { %1011 = vmatpush.msra.mxu1 %v976_v17 }
 0x44c   : > { %v973_v18 = vpop.f32.mrf.mxu0 }
 0x44d   : > { %1012 = vmatmul.f32.vlgmr.msra.gmra.mxu1 %v973_v18 }
 0x4ca   : > { %v1013_v20 = vpop.f32.mrf.mxu1 }
 0x4cb   : > { %v1014_v21 = vadd.f32 %v1347_v19, %v1013_v20 }
 0x4cd   : > { %1016 = vst [vmem:[#allocation16] sm:$0xff] %v1014_v21 }
 0x4ce PF: > { %p1297_p5 = scmp.eq.s32.totalorder %s1729_s17, 3  ;;  %s1634_s22 = smov [#allocation16]  }
 0x4cf   : > { %s1023_s1 = sshll.u32 %s1634_s22, 4  ;;  %s2085_s29 = sld [smem:[#allocation34_spill]]  ;;  %s1024_s1 = int_to_ptr.vmem [resolvable:$true] %s1023_s1 }
 0x4d5   : > { %s1025_s23 = sshll.u32 %s2085_s29, 4  ;;  %s1026_s23 = int_to_ptr.hbm [resolvable:$true] %s1025_s23 }
 0x4d6   : > { %1262 = dma.vmem_to_hbm [thread:$0]  (%p1297_p5), %s1024_s1, 128, %s1026_s23, [#allocation5]  }
 0x4d7   : > { %1608 = dma.done.wait (%p1297_p5), [#allocation5], 128  }
 0x4d8   : > { %1610 = vsyncadd (%p1297_p5), [#allocation5], 4294967168 }
 0x4d9 PF: > { %s2086_s16 = sld [smem:[#allocation24_spill]]  ;;  %s2089_s29 = smov %s1617_s30 }
 0x4da   : > { %s2087_s27 = sld [smem:[#allocation23_spill]] }
 0x4db   : > { %s2088_s15 = sld [smem:[#allocation25_spill]] }
 0x4df   : > { %p31_p6 = scmp.ge.s32.totalorder %s2086_s16, 6  }
 0x4e0   : > { %s2090_s30 = smov %s2087_s27 }
 0x4e1   :  { %33 = sbr.rel (!%p31_p6) target bundleno = 19 (0x13), region = 172 }
 0x4e6   :  { %1039 = vsyncpa [#allocation4], 1 }
 0x4e7   :  { %1041 = vsyncpa [#allocation4 + $0x1], 1 }
 0x4e8   :  { %1042 = vsyncpa [#allocation8], 1 }
 0x4e9   :  { %1043 = vsyncpa [#allocation12], 1 }
 0x4ea   :  { %1045 = vsyncpa [#allocation12 + $0x1], 1 }
 0x4eb   :  { %1046 = vsyncpa [#allocation15], 1 }
 0x4ec   :  { %1048 = vsyncpa [#allocation15 + $0x1], 1 }
 0x4ed   :  { %1049 = vsyncpa [#allocation5], 1 }
 0x4ee   :  { %1051 = vsyncpa [#allocation5 + $0x1], 1 }
 0x4ef   :  { %1052 = vsyncpa [#allocation6], 1 }
 0x4f0   :  { %1054 = vsyncpa [#allocation6 + $0x1], 1 }

</bundles_post_ra>
